<compile_context>
chip_gen: v7x
topology: tpu7x:2x2x1
jax: 0.10.0
libtpu: 0.0.40
codegen_flags: <defaults>
</compile_context>

<pallas_src>
import functools

import jax
import jax.numpy as jnp
import numpy as np
from jax.experimental import pallas as pl
from jax.experimental.pallas import tpu as pltpu


# ---------------------------------------------------------------------------
# Phase 1: top-k indices from probs/mask only (no reps traffic).
# ---------------------------------------------------------------------------
def _topk_index_kernel(probs_ref, mask_ref, ind_ref, sind_ref, *, topk):
    # probs_ref, mask_ref : [Bb, N]
    # ind_ref, sind_ref   : [Bb, K] int32 (torch.topk order / ascending order)
    Bb, N = probs_ref.shape
    K = topk

    # No softmax needed: top-k of softmax(z) == top-k of z (monotone transform).
    z = probs_ref[...].astype(jnp.float32) + mask_ref[...].astype(jnp.float32) * (-10000.0)

    iota_n = jax.lax.broadcasted_iota(jnp.int32, (Bb, N), 1)
    iota_k = jax.lax.broadcasted_iota(jnp.int32, (Bb, K), 1)

    # Iterative top-k (K is a small static Python int -> full unroll is cheapest).
    # TODO(synk): for large K convert these loops to lax.fori_loop to bound vreg live ranges.
    work = z
    ind = jnp.zeros((Bb, K), jnp.int32)   # descending-value order == torch.topk order
    for k in range(K):
        m = jnp.max(work, axis=-1, keepdims=True)                                   # [Bb, 1]
        idx = jnp.min(jnp.where(work == m, iota_n, N), axis=-1, keepdims=True)      # first-occurrence argmax
        idx = jnp.minimum(idx, N - 1)     # NaN guard: keeps phase-2 row DMAs in bounds
        ind = jnp.where(iota_k == k, idx, ind)
        work = jnp.where(iota_n == idx, -jnp.inf, work)

    ind_ref[...] = ind

    # ranks[b, k] = #{j : ind[b, j] < ind[b, k]}  (picks are distinct -> permutation)
    ranks = jnp.zeros((Bb, K), jnp.int32)
    for j in range(K):
        col_j = jnp.sum(jnp.where(iota_k == j, ind, 0), axis=-1, keepdims=True)     # ind[:, j]
        ranks = ranks + (col_j < ind).astype(jnp.int32)

    # ascending-sorted picked indices: sind[b, r] = ind[b, k] where ranks[b, k] == r
    sind = jnp.zeros((Bb, K), jnp.int32)
    for r in range(K):
        val_r = jnp.sum(jnp.where(ranks == r, ind, 0), axis=-1, keepdims=True)      # [Bb, 1]
        sind = jnp.where(iota_k == r, val_r, sind)

    sind_ref[...] = sind


# ---------------------------------------------------------------------------
# Phase 2: gather the K selected rows of reps per batch row (reps never enters VMEM
# wholesale; exactly K*D bytes per batch row are moved HBM -> VMEM staging -> HBM out).
# ---------------------------------------------------------------------------
def _gather_rows_kernel(sind_ref, reps_hbm, out_ref, copy_sems, *, topk, block_rows):
    # sind_ref : [B*K] int32 in SMEM (flat 1-D: avoids the 2-D SMEM lane-padding blowup)
    # reps_hbm : [B, N, D] ref left in HBM (memory_space=pl.ANY)
    # out_ref  : [block_rows, K, D] VMEM output block
    # copy_sems: (block_rows, K) DMA semaphores
    chunk = pl.program_id(0)
    base_row = chunk * block_rows

    # Issue ALL block_rows*K tiny row-DMAs before waiting on any, so the latency-bound
    # HBM reads are in flight concurrently.
    copies = []
    for i in range(block_rows):          # static unroll (block_rows, K are small ints)
        for k in range(topk):
            row = sind_ref[(base_row + i) * topk + k]
            cp = pltpu.make_async_copy(
                reps_hbm.at[pl.ds(base_row + i, 1), pl.ds(row, 1), :],   # (1,1,D) selected row
                out_ref.at[pl.ds(i, 1), pl.ds(k, 1), :],                 # slot (i,k) of out block
                copy_sems.at[i, k],
            )
            cp.start()
            copies.append(cp)
    for cp in copies:
        cp.wait()


# ---------------------------------------------------------------------------
# Block-size heuristics.
# ---------------------------------------------------------------------------
def _pick_index_block_rows(B, N, in_itemsize, *, vmem_budget_bytes=24 << 20, row_cap=128):
    """Rows per phase-1 step: big (fewer 0.35us steps, bigger DMAs), sublane-aligned
    (multiple of 8 or the full batch), dividing B, fitting a conservative VMEM budget,
    and leaving >=2 grid steps where possible (v7x megacore)."""
    per_row = (4 * in_itemsize + 16) * max(N, 1)   # 2 dbl-buffered inputs + ~4 f32 temporaries
    cap = max(1, min(row_cap, vmem_budget_bytes // per_row))
    candidates = [bb for bb in range(1, B + 1)
                  if B % bb == 0 and (bb % 8 == 0 or bb == B)]
    fitting = [bb for bb in candidates if bb <= cap] or candidates
    multi = [bb for bb in fitting if B // bb >= 2]
    return max(multi) if multi else max(fitting)


def _pick_gather_block_rows(B, K):
    """Rows per phase-2 step: keep ~<=64 DMAs/semaphores in flight per step, divide B,
    and leave >=2 grid steps where possible (v7x megacore)."""
    row_cap = max(1, min(16, 64 // max(K, 1)))
    divisors = [d for d in range(1, min(B, row_cap) + 1) if B % d == 0]
    multi = [d for d in divisors if B // d >= 2]
    return max(multi) if multi else max(divisors)


# ---------------------------------------------------------------------------
# Wrapper.
# ---------------------------------------------------------------------------
def gumbel_sampler(reps, probs, mask, sample_top_k):
    """Eval-mode GumbelSampler forward. Returns (sampled_reps [B,K,D], indices [B,K])."""
    B, N, D = reps.shape
    K = int(sample_top_k)

    in_itemsize = max(jnp.dtype(probs.dtype).itemsize, jnp.dtype(mask.dtype).itemsize)
    out_itemsize = jnp.dtype(reps.dtype).itemsize

    # ---- Phase 1: top-k indices (no reps traffic at all) ----
    Bb = _pick_index_block_rows(B, N, in_itemsize)
    grid1 = B // Bb
    vmem1_est = (2 * 2 * Bb * N * in_itemsize       # double-buffered probs/mask blocks
                 + 2 * 2 * Bb * K * 4               # double-buffered index output blocks
                 + 6 * Bb * N * 4)                  # in-kernel f32 temporaries
    vmem1 = int(min(48 << 20, max(16 << 20, 2 * vmem1_est)))   # v7x (64 MiB VMEM) safe

    idx_kernel = functools.partial(_topk_index_kernel, topk=K)
    ind, sind = pl.pallas_call(
        idx_kernel,
        out_shape=(
            jax.ShapeDtypeStruct((B, K), jnp.int32),
            jax.ShapeDtypeStruct((B, K), jnp.int32),
        ),
        grid_spec=pltpu.PrefetchScalarGridSpec(
            num_scalar_prefetch=0,
            grid=(grid1,),
            in_specs=[
                pl.BlockSpec((Bb, N), lambda b: (b, 0)),   # probs
                pl.BlockSpec((Bb, N), lambda b: (b, 0)),   # mask
            ],
            out_specs=[
                pl.BlockSpec((Bb, K), lambda b: (b, 0)),   # torch.topk-order indices
                pl.BlockSpec((Bb, K), lambda b: (b, 0)),   # ascending-order indices
            ],
        ),
        compiler_params=pltpu.CompilerParams(
            dimension_semantics=("parallel",),
            vmem_limit_bytes=vmem1,
        ),
        cost_estimate=pl.CostEstimate(
            flops=4 * B * N * K,
            transcendentals=0,
            bytes_accessed=2 * B * N * in_itemsize + 2 * B * K * 4,
        ),
    )(probs, mask)

    # ---- Phase 2: gather only the K selected rows of reps per batch ----
    sind_flat = sind.reshape(B * K)      # 1-D scalar-prefetch: SMEM pads only to next_pow2(4*B*K)
    Bb2 = _pick_gather_block_rows(B, K)
    grid2 = B // Bb2
    vmem2 = int(min(48 << 20, max(16 << 20, 4 * Bb2 * K * D * out_itemsize + (1 << 20))))

    gather_kernel = functools.partial(_gather_rows_kernel, topk=K, block_rows=Bb2)
    sampled = pl.pallas_call(
        gather_kernel,
        out_shape=jax.ShapeDtypeStruct((B, K, D), reps.dtype),
        grid_spec=pltpu.PrefetchScalarGridSpec(
            num_scalar_prefetch=1,                               # sind_flat -> SMEM
            grid=(grid2,),
            in_specs=[pl.BlockSpec(memory_space=pl.ANY)],        # reps stays in HBM
            out_specs=pl.BlockSpec((Bb2, K, D), lambda b, sind_s: (b, 0, 0)),
            scratch_shapes=[pltpu.SemaphoreType.DMA((Bb2, K))],
        ),
        compiler_params=pltpu.CompilerParams(
            dimension_semantics=("parallel",),
            vmem_limit_bytes=vmem2,
        ),
        cost_estimate=pl.CostEstimate(
            flops=0,
            transcendentals=0,
            bytes_accessed=2 * B * K * D * out_itemsize,
        ),
    )(sind_flat, reps)

    return sampled, ind


# ---------------------------------------------------------------------------
# Pure-JAX reference + self-test.
# ---------------------------------------------------------------------------
def _reference(reps, probs, mask, K):
    y = jax.nn.softmax(probs + mask * (-10000.0), axis=-1)
    _, ind = jax.lax.top_k(y, K)                                 # descending-value order
    sorted_idx = jnp.sort(ind, axis=-1)                          # boolean-mask gather order
    sampled = jnp.take_along_axis(reps, sorted_idx[..., None], axis=1)
    return sampled, ind


if __name__ == "__main__":
    B, N, D, K = 2, 16, 32, 4
    key = jax.random.PRNGKey(0)
    k1, k2 = jax.random.split(key)

    reps = jax.random.normal(k1, (B, N, D), dtype=jnp.float32)
    probs = jax.random.uniform(k2, (B, N), dtype=jnp.float32)
    # mask: 1.0 marks padded positions (pushed to -10000 inside the kernel)
    lengths = jnp.array([16, 12])
    mask = (jnp.arange(N)[None, :] >= lengths[:, None]).astype(jnp.float32)

    sampled, indices = gumbel_sampler(reps, probs, mask, K)
    jax.block_until_ready((sampled, indices))

    ref_sampled, ref_indices = _reference(reps, probs, mask, K)
    np.testing.assert_allclose(np.asarray(sampled), np.asarray(ref_sampled), rtol=1e-5, atol=1e-5)
    np.testing.assert_array_equal(np.asarray(indices), np.asarray(ref_indices))

    print("KERNEL_OK")
</pallas_src>

<mosaic_0001>
module attributes {stable_mosaic.version = 11 : i64} {
  func.func @_topk_index_kernel(%arg0: i32, %arg1: memref<2x16xf32, #tpu.memory_space<vmem>>, %arg2: memref<2x16xf32, #tpu.memory_space<vmem>>, %arg3: memref<2x4xi32, #tpu.memory_space<vmem>>, %arg4: memref<2x4xi32, #tpu.memory_space<vmem>>) attributes {dimension_semantics = [#tpu.dimension_semantics<parallel>], iteration_bounds = array<i64: 1>, scalar_prefetch = 0 : i64, scratch_operands = 0 : i64, tpu.core_type = #tpu.core_type<tc>, window_params = [{transform_indices = @transform_0, window_bounds = array<i64: 2, 16>}, {transform_indices = @transform_1, window_bounds = array<i64: 2, 16>}, {transform_indices = @transform_2, window_bounds = array<i64: 2, 4>}, {transform_indices = @transform_3, window_bounds = array<i64: 2, 4>}]} {
    %c0 = arith.constant 0 : index
    %c0_0 = arith.constant 0 : index
    %0 = vector.load %arg1[%c0, %c0_0] : memref<2x16xf32, #tpu.memory_space<vmem>>, vector<2x16xf32>
    %c0_1 = arith.constant 0 : index
    %c0_2 = arith.constant 0 : index
    %1 = vector.load %arg2[%c0_1, %c0_2] : memref<2x16xf32, #tpu.memory_space<vmem>>, vector<2x16xf32>
    %cst = arith.constant -1.000000e+04 : f32
    %2 = vector.broadcast %cst : f32 to vector<2x16xf32>
    %3 = arith.mulf %1, %2 : vector<2x16xf32>
    %4 = arith.addf %0, %3 : vector<2x16xf32>
    %5 = tpu.iota {dimensions = array<i32: 1>} : vector<2x16xi32>
    %6 = tpu.iota {dimensions = array<i32: 1>} : vector<2x4xi32>
    %c0_i32 = arith.constant 0 : i32
    %7 = vector.broadcast %c0_i32 : i32 to vector<2x4xi32>
    %cst_3 = arith.constant dense<0xFF800000> : vector<2xf32>
    %8 = vector.multi_reduction <maximumf>, %4, %cst_3 [1] : vector<2x16xf32> to vector<2xf32>
    %9 = vector.shape_cast %8 : vector<2xf32> to vector<2x1xf32>
    %10 = vector.broadcast %9 : vector<2x1xf32> to vector<2x16xf32>
    %11 = arith.cmpf oeq, %4, %10 : vector<2x16xf32>
    %c16_i32 = arith.constant 16 : i32
    %12 = vector.broadcast %c16_i32 : i32 to vector<2x16xi32>
    %13 = arith.select %11, %5, %12 : vector<2x16xi1>, vector<2x16xi32>
    %cst_4 = arith.constant dense<2147483647> : vector<2xi32>
    %14 = vector.multi_reduction <minsi>, %13, %cst_4 [1] : vector<2x16xi32> to vector<2xi32>
    %15 = vector.shape_cast %14 : vector<2xi32> to vector<2x1xi32>
    %c15_i32 = arith.constant 15 : i32
    %16 = vector.broadcast %c15_i32 : i32 to vector<2x1xi32>
    %17 = arith.minsi %15, %16 : vector<2x1xi32>
    %c0_i32_5 = arith.constant 0 : i32
    %18 = vector.broadcast %c0_i32_5 : i32 to vector<2x4xi32>
    %19 = arith.cmpi eq, %6, %18 : vector<2x4xi32>
    %20 = vector.shape_cast %17 : vector<2x1xi32> to vector<2x1xi32>
    %21 = vector.broadcast %20 : vector<2x1xi32> to vector<2x4xi32>
    %22 = arith.select %19, %21, %7 : vector<2x4xi1>, vector<2x4xi32>
    %23 = vector.broadcast %17 : vector<2x1xi32> to vector<2x16xi32>
    %24 = arith.cmpi eq, %5, %23 : vector<2x16xi32>
    %cst_6 = arith.constant 0xFF800000 : f32
    %25 = vector.broadcast %cst_6 : f32 to vector<2x16xf32>
    %26 = arith.select %24, %25, %4 : vector<2x16xi1>, vector<2x16xf32>
    %cst_7 = arith.constant dense<0xFF800000> : vector<2xf32>
    %27 = vector.multi_reduction <maximumf>, %26, %cst_7 [1] : vector<2x16xf32> to vector<2xf32>
    %28 = vector.shape_cast %27 : vector<2xf32> to vector<2x1xf32>
    %29 = vector.broadcast %28 : vector<2x1xf32> to vector<2x16xf32>
    %30 = arith.cmpf oeq, %26, %29 : vector<2x16xf32>
    %c16_i32_8 = arith.constant 16 : i32
    %31 = vector.broadcast %c16_i32_8 : i32 to vector<2x16xi32>
    %32 = arith.select %30, %5, %31 : vector<2x16xi1>, vector<2x16xi32>
    %cst_9 = arith.constant dense<2147483647> : vector<2xi32>
    %33 = vector.multi_reduction <minsi>, %32, %cst_9 [1] : vector<2x16xi32> to vector<2xi32>
    %34 = vector.shape_cast %33 : vector<2xi32> to vector<2x1xi32>
    %c15_i32_10 = arith.constant 15 : i32
    %35 = vector.broadcast %c15_i32_10 : i32 to vector<2x1xi32>
    %36 = arith.minsi %34, %35 : vector<2x1xi32>
    %c1_i32 = arith.constant 1 : i32
    %37 = vector.broadcast %c1_i32 : i32 to vector<2x4xi32>
    %38 = arith.cmpi eq, %6, %37 : vector<2x4xi32>
    %39 = vector.shape_cast %36 : vector<2x1xi32> to vector<2x1xi32>
    %40 = vector.broadcast %39 : vector<2x1xi32> to vector<2x4xi32>
    %41 = arith.select %38, %40, %22 : vector<2x4xi1>, vector<2x4xi32>
    %42 = vector.broadcast %36 : vector<2x1xi32> to vector<2x16xi32>
    %43 = arith.cmpi eq, %5, %42 : vector<2x16xi32>
    %cst_11 = arith.constant 0xFF800000 : f32
    %44 = vector.broadcast %cst_11 : f32 to vector<2x16xf32>
    %45 = arith.select %43, %44, %26 : vector<2x16xi1>, vector<2x16xf32>
    %cst_12 = arith.constant dense<0xFF800000> : vector<2xf32>
    %46 = vector.multi_reduction <maximumf>, %45, %cst_12 [1] : vector<2x16xf32> to vector<2xf32>
    %47 = vector.shape_cast %46 : vector<2xf32> to vector<2x1xf32>
    %48 = vector.broadcast %47 : vector<2x1xf32> to vector<2x16xf32>
    %49 = arith.cmpf oeq, %45, %48 : vector<2x16xf32>
    %c16_i32_13 = arith.constant 16 : i32
    %50 = vector.broadcast %c16_i32_13 : i32 to vector<2x16xi32>
    %51 = arith.select %49, %5, %50 : vector<2x16xi1>, vector<2x16xi32>
    %cst_14 = arith.constant dense<2147483647> : vector<2xi32>
    %52 = vector.multi_reduction <minsi>, %51, %cst_14 [1] : vector<2x16xi32> to vector<2xi32>
    %53 = vector.shape_cast %52 : vector<2xi32> to vector<2x1xi32>
    %c15_i32_15 = arith.constant 15 : i32
    %54 = vector.broadcast %c15_i32_15 : i32 to vector<2x1xi32>
    %55 = arith.minsi %53, %54 : vector<2x1xi32>
    %c2_i32 = arith.constant 2 : i32
    %56 = vector.broadcast %c2_i32 : i32 to vector<2x4xi32>
    %57 = arith.cmpi eq, %6, %56 : vector<2x4xi32>
    %58 = vector.shape_cast %55 : vector<2x1xi32> to vector<2x1xi32>
    %59 = vector.broadcast %58 : vector<2x1xi32> to vector<2x4xi32>
    %60 = arith.select %57, %59, %41 : vector<2x4xi1>, vector<2x4xi32>
    %61 = vector.broadcast %55 : vector<2x1xi32> to vector<2x16xi32>
    %62 = arith.cmpi eq, %5, %61 : vector<2x16xi32>
    %cst_16 = arith.constant 0xFF800000 : f32
    %63 = vector.broadcast %cst_16 : f32 to vector<2x16xf32>
    %64 = arith.select %62, %63, %45 : vector<2x16xi1>, vector<2x16xf32>
    %cst_17 = arith.constant dense<0xFF800000> : vector<2xf32>
    %65 = vector.multi_reduction <maximumf>, %64, %cst_17 [1] : vector<2x16xf32> to vector<2xf32>
    %66 = vector.shape_cast %65 : vector<2xf32> to vector<2x1xf32>
    %67 = vector.broadcast %66 : vector<2x1xf32> to vector<2x16xf32>
    %68 = arith.cmpf oeq, %64, %67 : vector<2x16xf32>
    %c16_i32_18 = arith.constant 16 : i32
    %69 = vector.broadcast %c16_i32_18 : i32 to vector<2x16xi32>
    %70 = arith.select %68, %5, %69 : vector<2x16xi1>, vector<2x16xi32>
    %cst_19 = arith.constant dense<2147483647> : vector<2xi32>
    %71 = vector.multi_reduction <minsi>, %70, %cst_19 [1] : vector<2x16xi32> to vector<2xi32>
    %72 = vector.shape_cast %71 : vector<2xi32> to vector<2x1xi32>
    %c15_i32_20 = arith.constant 15 : i32
    %73 = vector.broadcast %c15_i32_20 : i32 to vector<2x1xi32>
    %74 = arith.minsi %72, %73 : vector<2x1xi32>
    %c3_i32 = arith.constant 3 : i32
    %75 = vector.broadcast %c3_i32 : i32 to vector<2x4xi32>
    %76 = arith.cmpi eq, %6, %75 : vector<2x4xi32>
    %77 = vector.shape_cast %74 : vector<2x1xi32> to vector<2x1xi32>
    %78 = vector.broadcast %77 : vector<2x1xi32> to vector<2x4xi32>
    %79 = arith.select %76, %78, %60 : vector<2x4xi1>, vector<2x4xi32>
    %c0_21 = arith.constant 0 : index
    %c0_22 = arith.constant 0 : index
    %80 = vector.load %arg3[%c0_21, %c0_22] : memref<2x4xi32, #tpu.memory_space<vmem>>, vector<2x4xi32>
    tpu.vector_store %arg3[%c0_21, %c0_22], %79 {strides = array<i32>} : memref<2x4xi32, #tpu.memory_space<vmem>>, vector<2x4xi32>,
    %c0_i32_23 = arith.constant 0 : i32
    %81 = vector.broadcast %c0_i32_23 : i32 to vector<2x4xi32>
    %c0_i32_24 = arith.constant 0 : i32
    %82 = vector.broadcast %c0_i32_24 : i32 to vector<2x4xi32>
    %83 = arith.cmpi eq, %6, %82 : vector<2x4xi32>
    %c0_i32_25 = arith.constant 0 : i32
    %84 = vector.broadcast %c0_i32_25 : i32 to vector<2x4xi32>
    %85 = arith.select %83, %79, %84 : vector<2x4xi1>, vector<2x4xi32>
    %cst_26 = arith.constant dense<0> : vector<2xi32>
    %86 = vector.multi_reduction <add>, %85, %cst_26 [1] : vector<2x4xi32> to vector<2xi32>
    %87 = vector.shape_cast %86 : vector<2xi32> to vector<2x1xi32>
    %88 = vector.broadcast %87 : vector<2x1xi32> to vector<2x4xi32>
    %89 = arith.cmpi slt, %88, %79 : vector<2x4xi32>
    %90 = arith.extui %89 : vector<2x4xi1> to vector<2x4xi32>
    %91 = arith.addi %81, %90 : vector<2x4xi32>
    %c1_i32_27 = arith.constant 1 : i32
    %92 = vector.broadcast %c1_i32_27 : i32 to vector<2x4xi32>
    %93 = arith.cmpi eq, %6, %92 : vector<2x4xi32>
    %c0_i32_28 = arith.constant 0 : i32
    %94 = vector.broadcast %c0_i32_28 : i32 to vector<2x4xi32>
    %95 = arith.select %93, %79, %94 : vector<2x4xi1>, vector<2x4xi32>
    %cst_29 = arith.constant dense<0> : vector<2xi32>
    %96 = vector.multi_reduction <add>, %95, %cst_29 [1] : vector<2x4xi32> to vector<2xi32>
    %97 = vector.shape_cast %96 : vector<2xi32> to vector<2x1xi32>
    %98 = vector.broadcast %97 : vector<2x1xi32> to vector<2x4xi32>
    %99 = arith.cmpi slt, %98, %79 : vector<2x4xi32>
    %100 = arith.extui %99 : vector<2x4xi1> to vector<2x4xi32>
    %101 = arith.addi %91, %100 : vector<2x4xi32>
    %c2_i32_30 = arith.constant 2 : i32
    %102 = vector.broadcast %c2_i32_30 : i32 to vector<2x4xi32>
    %103 = arith.cmpi eq, %6, %102 : vector<2x4xi32>
    %c0_i32_31 = arith.constant 0 : i32
    %104 = vector.broadcast %c0_i32_31 : i32 to vector<2x4xi32>
    %105 = arith.select %103, %79, %104 : vector<2x4xi1>, vector<2x4xi32>
    %cst_32 = arith.constant dense<0> : vector<2xi32>
    %106 = vector.multi_reduction <add>, %105, %cst_32 [1] : vector<2x4xi32> to vector<2xi32>
    %107 = vector.shape_cast %106 : vector<2xi32> to vector<2x1xi32>
    %108 = vector.broadcast %107 : vector<2x1xi32> to vector<2x4xi32>
    %109 = arith.cmpi slt, %108, %79 : vector<2x4xi32>
    %110 = arith.extui %109 : vector<2x4xi1> to vector<2x4xi32>
    %111 = arith.addi %101, %110 : vector<2x4xi32>
    %c3_i32_33 = arith.constant 3 : i32
    %112 = vector.broadcast %c3_i32_33 : i32 to vector<2x4xi32>
    %113 = arith.cmpi eq, %6, %112 : vector<2x4xi32>
    %c0_i32_34 = arith.constant 0 : i32
    %114 = vector.broadcast %c0_i32_34 : i32 to vector<2x4xi32>
    %115 = arith.select %113, %79, %114 : vector<2x4xi1>, vector<2x4xi32>
    %cst_35 = arith.constant dense<0> : vector<2xi32>
    %116 = vector.multi_reduction <add>, %115, %cst_35 [1] : vector<2x4xi32> to vector<2xi32>
    %117 = vector.shape_cast %116 : vector<2xi32> to vector<2x1xi32>
    %118 = vector.broadcast %117 : vector<2x1xi32> to vector<2x4xi32>
    %119 = arith.cmpi slt, %118, %79 : vector<2x4xi32>
    %120 = arith.extui %119 : vector<2x4xi1> to vector<2x4xi32>
    %121 = arith.addi %111, %120 : vector<2x4xi32>
    %c0_i32_36 = arith.constant 0 : i32
    %122 = vector.broadcast %c0_i32_36 : i32 to vector<2x4xi32>
    %c0_i32_37 = arith.constant 0 : i32
    %123 = vector.broadcast %c0_i32_37 : i32 to vector<2x4xi32>
    %124 = arith.cmpi eq, %121, %123 : vector<2x4xi32>
    %c0_i32_38 = arith.constant 0 : i32
    %125 = vector.broadcast %c0_i32_38 : i32 to vector<2x4xi32>
    %126 = arith.select %124, %79, %125 : vector<2x4xi1>, vector<2x4xi32>
    %cst_39 = arith.constant dense<0> : vector<2xi32>
    %127 = vector.multi_reduction <add>, %126, %cst_39 [1] : vector<2x4xi32> to vector<2xi32>
    %128 = vector.shape_cast %127 : vector<2xi32> to vector<2x1xi32>
    %c0_i32_40 = arith.constant 0 : i32
    %129 = vector.broadcast %c0_i32_40 : i32 to vector<2x4xi32>
    %130 = arith.cmpi eq, %6, %129 : vector<2x4xi32>
    %131 = vector.shape_cast %128 : vector<2x1xi32> to vector<2x1xi32>
    %132 = vector.broadcast %131 : vector<2x1xi32> to vector<2x4xi32>
    %133 = arith.select %130, %132, %122 : vector<2x4xi1>, vector<2x4xi32>
    %c1_i32_41 = arith.constant 1 : i32
    %134 = vector.broadcast %c1_i32_41 : i32 to vector<2x4xi32>
    %135 = arith.cmpi eq, %121, %134 : vector<2x4xi32>
    %c0_i32_42 = arith.constant 0 : i32
    %136 = vector.broadcast %c0_i32_42 : i32 to vector<2x4xi32>
    %137 = arith.select %135, %79, %136 : vector<2x4xi1>, vector<2x4xi32>
    %cst_43 = arith.constant dense<0> : vector<2xi32>
    %138 = vector.multi_reduction <add>, %137, %cst_43 [1] : vector<2x4xi32> to vector<2xi32>
    %139 = vector.shape_cast %138 : vector<2xi32> to vector<2x1xi32>
    %c1_i32_44 = arith.constant 1 : i32
    %140 = vector.broadcast %c1_i32_44 : i32 to vector<2x4xi32>
    %141 = arith.cmpi eq, %6, %140 : vector<2x4xi32>
    %142 = vector.shape_cast %139 : vector<2x1xi32> to vector<2x1xi32>
    %143 = vector.broadcast %142 : vector<2x1xi32> to vector<2x4xi32>
    %144 = arith.select %141, %143, %133 : vector<2x4xi1>, vector<2x4xi32>
    %c2_i32_45 = arith.constant 2 : i32
    %145 = vector.broadcast %c2_i32_45 : i32 to vector<2x4xi32>
    %146 = arith.cmpi eq, %121, %145 : vector<2x4xi32>
    %c0_i32_46 = arith.constant 0 : i32
    %147 = vector.broadcast %c0_i32_46 : i32 to vector<2x4xi32>
    %148 = arith.select %146, %79, %147 : vector<2x4xi1>, vector<2x4xi32>
    %cst_47 = arith.constant dense<0> : vector<2xi32>
    %149 = vector.multi_reduction <add>, %148, %cst_47 [1] : vector<2x4xi32> to vector<2xi32>
    %150 = vector.shape_cast %149 : vector<2xi32> to vector<2x1xi32>
    %c2_i32_48 = arith.constant 2 : i32
    %151 = vector.broadcast %c2_i32_48 : i32 to vector<2x4xi32>
    %152 = arith.cmpi eq, %6, %151 : vector<2x4xi32>
    %153 = vector.shape_cast %150 : vector<2x1xi32> to vector<2x1xi32>
    %154 = vector.broadcast %153 : vector<2x1xi32> to vector<2x4xi32>
    %155 = arith.select %152, %154, %144 : vector<2x4xi1>, vector<2x4xi32>
    %c3_i32_49 = arith.constant 3 : i32
    %156 = vector.broadcast %c3_i32_49 : i32 to vector<2x4xi32>
    %157 = arith.cmpi eq, %121, %156 : vector<2x4xi32>
    %c0_i32_50 = arith.constant 0 : i32
    %158 = vector.broadcast %c0_i32_50 : i32 to vector<2x4xi32>
    %159 = arith.select %157, %79, %158 : vector<2x4xi1>, vector<2x4xi32>
    %cst_51 = arith.constant dense<0> : vector<2xi32>
    %160 = vector.multi_reduction <add>, %159, %cst_51 [1] : vector<2x4xi32> to vector<2xi32>
    %161 = vector.shape_cast %160 : vector<2xi32> to vector<2x1xi32>
    %c3_i32_52 = arith.constant 3 : i32
    %162 = vector.broadcast %c3_i32_52 : i32 to vector<2x4xi32>
    %163 = arith.cmpi eq, %6, %162 : vector<2x4xi32>
    %164 = vector.shape_cast %161 : vector<2x1xi32> to vector<2x1xi32>
    %165 = vector.broadcast %164 : vector<2x1xi32> to vector<2x4xi32>
    %166 = arith.select %163, %165, %155 : vector<2x4xi1>, vector<2x4xi32>
    %c0_53 = arith.constant 0 : index
    %c0_54 = arith.constant 0 : index
    %167 = vector.load %arg4[%c0_53, %c0_54] : memref<2x4xi32, #tpu.memory_space<vmem>>, vector<2x4xi32>
    tpu.vector_store %arg4[%c0_53, %c0_54], %166 {strides = array<i32>} : memref<2x4xi32, #tpu.memory_space<vmem>>, vector<2x4xi32>,
    return
  }
  func.func @transform_0(%arg0: i32) -> (i32, i32) {
    %c0_i32 = arith.constant 0 : i32
    %c0_i32_0 = arith.constant 0 : i32
    return %arg0, %c0_i32 : i32, i32
  }
  func.func @transform_1(%arg0: i32) -> (i32, i32) {
    %c0_i32 = arith.constant 0 : i32
    %c0_i32_0 = arith.constant 0 : i32
    return %arg0, %c0_i32 : i32, i32
  }
  func.func @transform_2(%arg0: i32) -> (i32, i32) {
    %c0_i32 = arith.constant 0 : i32
    %c0_i32_0 = arith.constant 0 : i32
    return %arg0, %c0_i32 : i32, i32
  }
  func.func @transform_3(%arg0: i32) -> (i32, i32) {
    %c0_i32 = arith.constant 0 : i32
    %c0_i32_0 = arith.constant 0 : i32
    return %arg0, %c0_i32 : i32, i32
  }
}

</mosaic_0001>

<bundles_post_ra>
// kernel: tpu_custom_call.1
= control target key start
LH: loop header
LB: loop body
LE: loop exit
PB: predicated region body
PF: predicated region fallthrough
CT: control target
= control target key end

     0   :  { %9 = vsyncpa [#allocation3], 0  ;;  %s507_s0 = inlined_call_operand.hbm [shape: f32[2,16], index: 0, kind: input, shape index: {}]   ;;  %s508_s1 = inlined_call_operand.vmem [shape: f32[2,16], index: 1, kind: input, shape index: {}]   ;;  %s509_s2 = inlined_call_operand.hbm [shape: s32[2,4], index: 2, kind: output, shape index: {0}]   ;;  %s510_s3 = inlined_call_operand.hbm [shape: s32[2,4], index: 3, kind: output, shape index: {1}]  }
   0x1   :  { %10 = vsyncpa [#allocation4], 0 }
   0x2   :  { %11 = vsyncpa [#allocation7], 0  ;;  %s375_s12 = smov [#allocation2]   ;;  %s303_s16 = scalar_lea.hbm %s507_s0, 32 }
   0x3   :  { %s18_s13 = sshll.u32 %s375_s12, 4  ;;  %p304_p0 = scmp.ne.s32.totalorder %s507_s0, %s303_s16  ;;  %s19_s13 = int_to_ptr.vmem [resolvable:$true] %s18_s13 }
   0x4   :  { %p307_p1 = scmp.lt.u32.totalorder %s303_s16, %s507_s0 }
   0x6   :  { %p309_p2 = pnand %p307_p1, %p304_p0 }
   0x8   :  { %312 = shalt.err (!%p309_p2)
}
   0x9   :  { %s313_s21 = scalar_lea.vmem %s19_s13, 32  ;;  %p318_p4 = scmp.lt.s32.totalorder %s19_s13, %s19_s13 }
   0xa   :  { %p314_p3 = scmp.ne.s32.totalorder %s19_s13, %s313_s21  ;;  %p319_p5 = scmp.lt.s32.totalorder %s313_s21, %s313_s21 }
   0xc   :  { %p320_p6 = por %p319_p5, %p318_p4 }
   0xe   :  { %p321_p7 = pnand %p320_p6, %p314_p3 }
  0x10   :  { %324 = shalt.err (!%p321_p7)
}
  0x11   :  { %21 = dma.hbm_to_vmem [thread:$0]  %s507_s0, 32, %s19_s13, [#allocation3]  }
  0x12   :  { %369 = dma.done.wait [#allocation3], 32  }
  0x13   :  { %370 = vsyncadd [#allocation3], 4294967264  ;;  %v27_v0 = vld [vmem:[#allocation2] sm:$0x3]  ;;  %vm33_vm0 = vcmask 123904   ;;  %v31_v5 = vlaneseq  ;;  %s377_s0 = smov [#allocation5]  }
  0x14   :  { %v28_v1 = vld [vmem:[%s508_s1] sm:$0x3]  ;;  %s276_s1 = sshll.u32 %s377_s0, 4  ;;  %s277_s1 = int_to_ptr.vmem [resolvable:$true] %s276_s1 }
  0x15   :  { %v29_v2 = vmul.f32 -10000.0, %v28_v1  ;;  %v415_v6 = vand.u32 127, %v31_v5  ;;  %s325_s26 = scalar_lea.vmem %s277_s1, 32  ;;  %p330_p9 = scmp.lt.s32.totalorder %s277_s1, %s277_s1 }
  0x16   :  { %p326_p8 = scmp.ne.s32.totalorder %s277_s1, %s325_s26  ;;  %p331_p10 = scmp.lt.s32.totalorder %s325_s26, %s325_s26 }
  0x17   :  { %v30_v3 = vadd.f32 %v29_v2, %v27_v0  ;;  %vm56_vm7 = vcmp.eq.s32.totalorder %v415_v6, 0  ;;  %vm82_vm8 = vcmp.eq.s32.totalorder %v415_v6, 1  ;;  %vm108_vm13 = vcmp.eq.s32.totalorder %v415_v6, 2 }
  0x18   :  { %p332_p11 = por %p331_p10, %p330_p9 }
  0x19   :  { %v34_v4 = vsel %vm33_vm0, %v30_v3, -inf }
  0x1a   :  { %35 = vmax.xlane.f32.xlu0 %v34_v4  ;;  %p333_p12 = pnand %p332_p11, %p326_p8 }
  0xa7   :  { %v36_v7 = vpop.xlane.xlu0 %35 }
  0xa8   :  { %vm37_vm1 = vcmp.eq.f32.partialorder %v30_v3, %v36_v7 }
  0xa9   :  { %v38_v8 = vsel %vm37_vm1, %v415_v6, 16 }
  0xaa   :  { %v39_v9 = vsel %vm33_vm0, %v38_v8, 2147483647 }
  0xab   :  { %v41_v10 = vshra.s32 %v39_v9, 16  ;;  %v40_v12 = vand.u32 65535, %v39_v9 }
  0xad   :  { %v43_v11 = vcvt.s32.f32 %v41_v10  ;;  %v42_v14 = vcvt.s32.f32 %v40_v12 }
  0xaf   :  { %44 = vmin.xlane.f32.xlu0 %v43_v11 }
 0x13c   :  { %v45_v13 = vpop.xlane.xlu0 %44 }
 0x13d   :  { %vm46_vm2 = vcmp.eq.f32.partialorder %v43_v11, %v45_v13  ;;  %v51_v16 = vcvt.f32.s32 %v45_v13 }
 0x13e   :  { %v47_v15 = vsel %vm46_vm2, %v42_v14, inf }
 0x13f   :  { %48 = vmin.xlane.f32.xlu1 %v47_v15  ;;  %v52_v18 = vshll.u32 %v51_v16, 16 }
 0x1cc   :  { %v49_v17 = vpop.xlane.xlu1 %48 }
 0x1cd   :  { %v50_v19 = vcvt.f32.s32 %v49_v17 }
 0x1cf   :  { %v53_v20 = vadd.s32 %v52_v18, %v50_v19 }
 0x1d1   :  { %vm54_vm3 = vcmp.lt.s32.totalorder %v53_v20, 15 }
 0x1d2   :  { %v55_v21 = vsel %vm54_vm3, %v53_v20, 15  ;;  %vm134_vm3 = vcmp.eq.s32.totalorder %v415_v6, 3 }
 0x1d3   :  { %vm58_vm4 = vcmp.eq.s32.totalorder %v415_v6, %v55_v21  ;;  %v57_v38 = vsel %vm56_vm7, %v55_v21, 0 }
 0x1d4   :  { %v59_v22 = vsel %vm58_vm4, -inf, %v30_v3 }
 0x1d5   :  { %v60_v23 = vsel %vm33_vm0, %v59_v22, -inf }
 0x1d6   :  { %61 = vmax.xlane.f32.xlu1 %v60_v23 }
 0x263   :  { %v62_v24 = vpop.xlane.xlu1 %61 }
 0x264   :  { %vm63_vm5 = vcmp.eq.f32.partialorder %v59_v22, %v62_v24 }
 0x265   :  { %v64_v25 = vsel %vm63_vm5, %v415_v6, 16  ;;  %vm136_vm5 = vcmask 25600  }
 0x266   :  { %v65_v26 = vsel %vm33_vm0, %v64_v25, 2147483647 }
 0x267   :  { %v67_v27 = vshra.s32 %v65_v26, 16  ;;  %v66_v29 = vand.u32 65535, %v65_v26 }
 0x269   :  { %v69_v28 = vcvt.s32.f32 %v67_v27  ;;  %v68_v31 = vcvt.s32.f32 %v66_v29 }
 0x26b   :  { %70 = vmin.xlane.f32.xlu0 %v69_v28 }
 0x2f8   :  { %v71_v30 = vpop.xlane.xlu0 %70 }
 0x2f9   :  { %vm72_vm6 = vcmp.eq.f32.partialorder %v69_v28, %v71_v30  ;;  %v77_v33 = vcvt.f32.s32 %v71_v30 }
 0x2fa   :  { %v73_v32 = vsel %vm72_vm6, %v68_v31, inf }
 0x2fb   :  { %74 = vmin.xlane.f32.xlu1 %v73_v32  ;;  %v78_v35 = vshll.u32 %v77_v33, 16 }
 0x388   :  { %v75_v34 = vpop.xlane.xlu1 %74 }
 0x389   :  { %v76_v36 = vcvt.f32.s32 %v75_v34 }
 0x38b   :  { %v79_v37 = vadd.s32 %v78_v35, %v76_v36 }
 0x38d   :  { %vm80_vm9 = vcmp.lt.s32.totalorder %v79_v37, 15 }
 0x38e   :  { %v81_v39 = vsel %vm80_vm9, %v79_v37, 15 }
 0x38f   :  { %vm84_vm10 = vcmp.eq.s32.totalorder %v415_v6, %v81_v39  ;;  %v83_v40 = vsel %vm82_vm8, %v81_v39, %v57_v38 }
 0x390   :  { %v85_v41 = vsel %vm84_vm10, -inf, %v59_v22 }
 0x391   :  { %v86_v42 = vsel %vm33_vm0, %v85_v41, -inf }
 0x392   :  { %87 = vmax.xlane.f32.xlu0 %v86_v42 }
 0x41f   :  { %v88_v43 = vpop.xlane.xlu0 %87 }
 0x420   :  { %vm89_vm11 = vcmp.eq.f32.partialorder %v85_v41, %v88_v43 }
 0x421   :  { %v90_v44 = vsel %vm89_vm11, %v415_v6, 16 }
 0x422   :  { %v91_v45 = vsel %vm33_vm0, %v90_v44, 2147483647 }
 0x423   :  { %v93_v46 = vshra.s32 %v91_v45, 16  ;;  %v92_v48 = vand.u32 65535, %v91_v45 }
 0x425   :  { %v95_v47 = vcvt.s32.f32 %v93_v46  ;;  %v94_v50 = vcvt.s32.f32 %v92_v48 }
 0x427   :  { %96 = vmin.xlane.f32.xlu1 %v95_v47 }
 0x4b4   :  { %v97_v49 = vpop.xlane.xlu1 %96 }
 0x4b5   :  { %vm98_vm12 = vcmp.eq.f32.partialorder %v95_v47, %v97_v49  ;;  %v103_v52 = vcvt.f32.s32 %v97_v49 }
 0x4b6   :  { %v99_v51 = vsel %vm98_vm12, %v94_v50, inf }
 0x4b7   :  { %100 = vmin.xlane.f32.xlu0 %v99_v51  ;;  %v104_v54 = vshll.u32 %v103_v52, 16 }
 0x544   :  { %v101_v53 = vpop.xlane.xlu0 %100 }
 0x545   :  { %v102_v55 = vcvt.f32.s32 %v101_v53 }
 0x547   :  { %v105_v56 = vadd.s32 %v104_v54, %v102_v55 }
 0x549   :  { %vm106_vm14 = vcmp.lt.s32.totalorder %v105_v56, 15 }
 0x54a   :  { %v107_v57 = vsel %vm106_vm14, %v105_v56, 15 }
 0x54b   :  { %vm110_vm15 = vcmp.eq.s32.totalorder %v415_v6, %v107_v57  ;;  %v109_v58 = vsel %vm108_vm13, %v107_v57, %v83_v40 }
 0x54c   :  { %v111_v59 = vsel %vm110_vm15, -inf, %v85_v41 }
 0x54d   :  { %v112_v60 = vsel %vm33_vm0, %v111_v59, -inf }
 0x54e   :  { %113 = vmax.xlane.f32.xlu1 %v112_v60 }
 0x5db   :  { %v114_v61 = vpop.xlane.xlu1 %113 }
 0x5dc   :  { %vm115_vm1 = vcmp.eq.f32.partialorder %v111_v59, %v114_v61  ;;  %v376_v59 = vmov 0  }
 0x5dd   :  { %v116_v62 = vsel %vm115_vm1, %v415_v6, 16 }
 0x5de   :  { %v117_v63 = vsel %vm33_vm0, %v116_v62, 2147483647 }
 0x5df   :  { %v119_v0 = vshra.s32 %v117_v63, 16  ;;  %v118_v2 = vand.u32 65535, %v117_v63 }
 0x5e1   :  { %v121_v1 = vcvt.s32.f32 %v119_v0  ;;  %v120_v4 = vcvt.s32.f32 %v118_v2 }
 0x5e3   :  { %122 = vmin.xlane.f32.xlu0 %v121_v1 }
 0x670   :  { %v123_v3 = vpop.xlane.xlu0 %122 }
 0x671   :  { %vm124_vm2 = vcmp.eq.f32.partialorder %v121_v1, %v123_v3  ;;  %v129_v7 = vcvt.f32.s32 %v123_v3 }
 0x672   :  { %v125_v5 = vsel %vm124_vm2, %v120_v4, inf }
 0x673   :  { %126 = vmin.xlane.f32.xlu1 %v125_v5  ;;  %v130_v9 = vshll.u32 %v129_v7, 16 }
 0x700   :  { %v127_v8 = vpop.xlane.xlu1 %126 }
 0x701   :  { %v128_v10 = vcvt.f32.s32 %v127_v8 }
 0x703   :  { %v131_v11 = vadd.s32 %v130_v9, %v128_v10 }
 0x705   :  { %vm132_vm4 = vcmp.lt.s32.totalorder %v131_v11, 15 }
 0x706   :  { %v133_v12 = vsel %vm132_vm4, %v131_v11, 15 }
 0x707   :  { %v443_v13 = vsel %vm134_vm3, %v133_v12, %v109_v58  ;;  %v188_v26 = vsel %vm134_vm3, %v133_v12, 0 }
 0x708   :  { %v154_v14 = vsel %vm82_vm8, %v443_v13, 0  ;;  %137 = vst.msk [vmem:[#allocation5] sm:$0x3] %vm136_vm5, %v443_v13  ;;  %v138_v15 = vsel %vm56_vm7, %v443_v13, 0  ;;  %v171_v20 = vsel %vm108_vm13, %v443_v13, 0  ;;  %v189_v31 = vsel %vm136_vm5, %v188_v26, 0 }
 0x709   :  { %v155_v16 = vsel %vm136_vm5, %v154_v14, 0  ;;  %v139_v17 = vsel %vm136_vm5, %v138_v15, 0  ;;  %v172_v25 = vsel %vm136_vm5, %v171_v20, 0  ;;  %v190_v34 = vand.u32 65535, %v189_v31 }
 0x70a   :  { %v157_v18 = vshrl.u32 %v155_v16, 16  ;;  %v141_v19 = vshrl.u32 %v139_v17, 16  ;;  %v156_v23 = vand.u32 65535, %v155_v16  ;;  %v140_v24 = vand.u32 65535, %v139_v17 }
 0x70b   :  { %v173_v29 = vand.u32 65535, %v172_v25  ;;  %v174_v30 = vshrl.u32 %v172_v25, 16  ;;  %v191_v35 = vshrl.u32 %v189_v31, 16  ;;  %v192_v36 = vcvt.s32.f32 %v190_v34 }
 0x70c   :  { %v159_v21 = vcvt.s32.f32 %v157_v18  ;;  %v143_v22 = vcvt.s32.f32 %v141_v19  ;;  %v158_v27 = vcvt.s32.f32 %v156_v23  ;;  %v142_v28 = vcvt.s32.f32 %v140_v24 }
 0x70d   :  { %v175_v32 = vcvt.s32.f32 %v173_v29  ;;  %v176_v33 = vcvt.s32.f32 %v174_v30  ;;  %v193_v37 = vcvt.s32.f32 %v191_v35 }
 0x70e   :  { %162 = vadd.xlane.f32.xlu1 %v159_v21  ;;  %146 = vadd.xlane.f32.xlu0 %v143_v22 }
 0x712   :  { %160 = vadd.xlane.f32.xlu1 %v158_v27  ;;  %144 = vadd.xlane.f32.xlu0 %v142_v28 }
 0x716   :  { %177 = vadd.xlane.f32.xlu1 %v175_v32  ;;  %179 = vadd.xlane.f32.xlu0 %v176_v33 }
 0x71a   :  { %194 = vadd.xlane.f32.xlu1 %v192_v36  ;;  %196 = vadd.xlane.f32.xlu0 %v193_v37 }
 0x79b   :  { %v163_v38 = vpop.xlane.xlu1 %162  ;;  %v147_v39 = vpop.xlane.xlu0 %146 }
 0x79c   :  { %v165_v40 = vcvt.f32.s32 %v163_v38  ;;  %v149_v41 = vcvt.f32.s32 %v147_v39 }
 0x79e   :  { %v166_v44 = vshll.u32 %v165_v40, 16  ;;  %v150_v45 = vshll.u32 %v149_v41, 16 }
 0x79f   :  { %v161_v42 = vpop.xlane.xlu1 %160  ;;  %v145_v43 = vpop.xlane.xlu0 %144 }
 0x7a0   :  { %v164_v46 = vcvt.f32.s32 %v161_v42  ;;  %v148_v47 = vcvt.f32.s32 %v145_v43 }
 0x7a2   :  { %v167_v48 = vadd.s32 %v166_v44, %v164_v46  ;;  %v151_v49 = vadd.s32 %v150_v45, %v148_v47 }
 0x7a3   :  { %v178_v50 = vpop.xlane.xlu1 %177  ;;  %v180_v51 = vpop.xlane.xlu0 %179 }
 0x7a4   :  { %v182_v52 = vcvt.f32.s32 %v180_v51  ;;  %vm168_vm0 = vcmp.lt.s32.totalorder %v167_v48, %v443_v13  ;;  %vm152_vm6 = vcmp.lt.s32.totalorder %v151_v49, %v443_v13  ;;  %v181_v53 = vcvt.f32.s32 %v178_v50 }
 0x7a5   :  { %v169_v60 = vsel %vm168_vm0, 1, %v376_v59  ;;  %v153_v61 = vsel %vm152_vm6, 1, %v376_v59 }
 0x7a6   :  { %v183_v54 = vshll.u32 %v182_v52, 16  ;;  %v170_v1 = vadd.s32 %v169_v60, %v153_v61 }
 0x7a7   :  { %v195_v55 = vpop.xlane.xlu1 %194  ;;  %v197_v56 = vpop.xlane.xlu0 %196 }
 0x7a8   :  { %v184_v57 = vadd.s32 %v183_v54, %v181_v53  ;;  %v199_v58 = vcvt.f32.s32 %v197_v56  ;;  %v198_v62 = vcvt.f32.s32 %v195_v55 }
 0x7aa   :  { %vm185_vm9 = vcmp.lt.s32.totalorder %v184_v57, %v443_v13  ;;  %v200_v63 = vshll.u32 %v199_v58, 16 }
 0x7ab   :  { %v186_v0 = vsel %vm185_vm9, 1, %v376_v59 }
 0x7ac   :  { %v201_v2 = vadd.s32 %v200_v63, %v198_v62  ;;  %v187_v3 = vadd.s32 %v186_v0, %v170_v1 }
 0x7ae   :  { %vm202_vm10 = vcmp.lt.s32.totalorder %v201_v2, %v443_v13 }
 0x7af   :  { %v203_v4 = vsel %vm202_vm10, 1, %v376_v59 }
 0x7b0   :  { %v204_v5 = vadd.s32 %v203_v4, %v187_v3 }
 0x7b2   :  { %vm221_vm11 = vcmp.eq.s32.totalorder %v204_v5, 1  ;;  %vm205_vm12 = vcmp.eq.s32.totalorder %v204_v5, 0  ;;  %vm237_vm14 = vcmp.eq.s32.totalorder %v204_v5, 2  ;;  %vm253_vm15 = vcmp.eq.s32.totalorder %v204_v5, 3 }
 0x7b3   :  { %v222_v7 = vsel %vm221_vm11, %v443_v13, 0  ;;  %v206_v8 = vsel %vm205_vm12, %v443_v13, 0  ;;  %v238_v9 = vsel %vm237_vm14, %v443_v13, 0  ;;  %v254_v16 = vsel %vm253_vm15, %v443_v13, 0 }
 0x7b4   :  { %v223_v10 = vsel %vm136_vm5, %v222_v7, 0  ;;  %v207_v11 = vsel %vm136_vm5, %v206_v8, 0  ;;  %v239_v12 = vsel %vm136_vm5, %v238_v9, 0  ;;  %v255_v21 = vsel %vm136_vm5, %v254_v16, 0 }
 0x7b5   :  { %v225_v14 = vshrl.u32 %v223_v10, 16  ;;  %v209_v15 = vshrl.u32 %v207_v11, 16  ;;  %v241_v19 = vshrl.u32 %v239_v12, 16  ;;  %v208_v20 = vand.u32 65535, %v207_v11 }
 0x7b6   :  { %v257_v24 = vshrl.u32 %v255_v21, 16  ;;  %v224_v25 = vand.u32 65535, %v223_v10  ;;  %v256_v28 = vand.u32 65535, %v255_v21  ;;  %v240_v29 = vand.u32 65535, %v239_v12 }
 0x7b7   :  { %v227_v17 = vcvt.s32.f32 %v225_v14  ;;  %v211_v18 = vcvt.s32.f32 %v209_v15  ;;  %v243_v22 = vcvt.s32.f32 %v241_v19  ;;  %v210_v23 = vcvt.s32.f32 %v208_v20 }
 0x7b8   :  { %v259_v26 = vcvt.s32.f32 %v257_v24  ;;  %v226_v27 = vcvt.s32.f32 %v224_v25  ;;  %v258_v13 = vcvt.s32.f32 %v256_v28  ;;  %v242_v30 = vcvt.s32.f32 %v240_v29 }
 0x7b9   :  { %230 = vadd.xlane.f32.xlu1 %v227_v17  ;;  %214 = vadd.xlane.f32.xlu0 %v211_v18 }
 0x7bd   :  { %246 = vadd.xlane.f32.xlu1 %v243_v22  ;;  %212 = vadd.xlane.f32.xlu0 %v210_v23 }
 0x7c1   :  { %262 = vadd.xlane.f32.xlu1 %v259_v26  ;;  %228 = vadd.xlane.f32.xlu0 %v226_v27 }
 0x7c5   :  { %260 = vadd.xlane.f32.xlu1 %v258_v13  ;;  %244 = vadd.xlane.f32.xlu0 %v242_v30 }
 0x7c6   :  { %336 = shalt.err (!%p333_p12)
}
 0x7c7   :  { %s337_s29 = scalar_lea.hbm %s509_s2, 32 }
 0x7c8   :  { %p338_p13 = scmp.ne.s32.totalorder %s509_s2, %s337_s29  ;;  %p341_p0 = scmp.lt.u32.totalorder %s337_s29, %s509_s2 }
 0x7ca   :  { %p343_p1 = pnand %p341_p0, %p338_p13 }
 0x7cc   :  { %346 = shalt.err (!%p343_p1)
}
 0x7cd   :  { %279 = dma.vmem_to_hbm [thread:$0]  %s277_s1, 32, %s509_s2, [#allocation4]  }
 0x7ce   :  { %s378_s2 = smov [#allocation6]  }
 0x7cf   :  { %s286_s9 = sshll.u32 %s378_s2, 4  ;;  %s287_s9 = int_to_ptr.vmem [resolvable:$true] %s286_s9 }
 0x7d0   :  { %s347_s10 = scalar_lea.vmem %s287_s9, 32  ;;  %p352_p3 = scmp.lt.s32.totalorder %s287_s9, %s287_s9 }
 0x7d1   :  { %p348_p2 = scmp.ne.s32.totalorder %s287_s9, %s347_s10  ;;  %p353_p4 = scmp.lt.s32.totalorder %s347_s10, %s347_s10 }
 0x7d3   :  { %p354_p5 = por %p353_p4, %p352_p3 }
 0x7d5   :  { %p355_p6 = pnand %p354_p5, %p348_p2 }
 0x846   :  { %v231_v31 = vpop.xlane.xlu1 %230  ;;  %v215_v32 = vpop.xlane.xlu0 %214 }
 0x847   :  { %v217_v35 = vcvt.f32.s32 %v215_v32  ;;  %v233_v36 = vcvt.f32.s32 %v231_v31 }
 0x849   :  { %v218_v40 = vshll.u32 %v217_v35, 16  ;;  %v234_v44 = vshll.u32 %v233_v36, 16 }
 0x84a   :  { %v247_v33 = vpop.xlane.xlu1 %246  ;;  %v213_v34 = vpop.xlane.xlu0 %212 }
 0x84b   :  { %v216_v37 = vcvt.f32.s32 %v213_v34  ;;  %v249_v41 = vcvt.f32.s32 %v247_v33 }
 0x84d   :  { %v219_v45 = vadd.s32 %v218_v40, %v216_v37  ;;  %v250_v49 = vshll.u32 %v249_v41, 16 }
 0x84e   :  { %v263_v38 = vpop.xlane.xlu1 %262  ;;  %v229_v39 = vpop.xlane.xlu0 %228 }
 0x84f   :  { %v265_v42 = vcvt.f32.s32 %v263_v38  ;;  %v232_v43 = vcvt.f32.s32 %v229_v39  ;;  %v220_v53 = vsel %vm56_vm7, %v219_v45, 0 }
 0x851   :  { %v235_v46 = vadd.s32 %v234_v44, %v232_v43  ;;  %v266_v50 = vshll.u32 %v265_v42, 16 }
 0x852   :  { %v261_v47 = vpop.xlane.xlu1 %260  ;;  %v245_v48 = vpop.xlane.xlu0 %244 }
 0x853   :  { %v264_v51 = vcvt.f32.s32 %v261_v47  ;;  %v248_v52 = vcvt.f32.s32 %v245_v48  ;;  %v236_v56 = vsel %vm82_vm8, %v235_v46, %v220_v53 }
 0x855   :  { %v267_v54 = vadd.s32 %v266_v50, %v264_v51  ;;  %v251_v55 = vadd.s32 %v250_v49, %v248_v52 }
 0x857   :  { %v252_v57 = vsel %vm108_vm13, %v251_v55, %v236_v56 }
 0x858   :  { %v268_v58 = vsel %vm134_vm3, %v267_v54, %v252_v57 }
 0x859   :  { %269 = vst.msk [vmem:[#allocation6] sm:$0x3] %vm136_vm5, %v268_v58 }
 0x85a   :  { %358 = shalt.err (!%p355_p6)
}
 0x85b   :  { %s359_s13 = scalar_lea.hbm %s510_s3, 32 }
 0x85c   :  { %p360_p7 = scmp.ne.s32.totalorder %s510_s3, %s359_s13  ;;  %p363_p8 = scmp.lt.u32.totalorder %s359_s13, %s510_s3 }
 0x85e   :  { %p365_p9 = pnand %p363_p8, %p360_p7 }
 0x860   :  { %368 = shalt.err (!%p365_p9)
}
 0x861   :  { %289 = dma.vmem_to_hbm [thread:$0]  %s287_s9, 32, %s510_s3, [#allocation7]  }
 0x862   :  { %371 = dma.done.wait [#allocation4], 32  }
 0x863   :  { %372 = vsyncadd [#allocation4], 4294967264 }
 0x864   :  { %373 = dma.done.wait [#allocation7], 32  }
 0x865   :  { %374 = vsyncadd [#allocation7], 4294967264 }
 0x866   :  { %296 = vsyncpa [#allocation3], 1 }
 0x867   :  { %297 = vsyncpa [#allocation4], 1 }
 0x868   :  { %298 = vsyncpa [#allocation7], 1 }

</bundles_post_ra>
